<compile_context>
chip_gen: v7x
topology: tpu7x:2x2x1
jax: 0.10.0
libtpu: 0.0.40
codegen_flags: <defaults>
</compile_context>

<pallas_src>
import functools

import jax
import jax.numpy as jnp
from jax.experimental import pallas as pl
from jax.experimental.pallas import tpu as pltpu


# ---------------------------------------------------------------------------
# In-kernel helpers
# ---------------------------------------------------------------------------
def _spatial_taps(H, W):
    """(flat_shift, validity_mask) for the 9 taps of a 3x3 / pad-1 conv.

    Operates on images flattened to a length-H*W lane axis.  Masks are built
    with comparisons and bitwise AND only (no vector integer division).
    """
    HW = H * W
    assert W & (W - 1) == 0, "W must be a power of two for the mask math"
    idx = jax.lax.broadcasted_iota(jnp.int32, (1, HW), 1)
    col = idx & (W - 1)  # == idx % W

    taps = []
    for dh in (-1, 0, 1):
        for dw in (-1, 0, 1):
            conds = []
            if dh == -1:
                conds.append(idx >= W)          # h - 1 >= 0
            elif dh == 1:
                conds.append(idx < HW - W)      # h + 1 < H
            if dw == -1:
                conds.append(col >= 1)          # w - 1 >= 0
            elif dw == 1:
                conds.append(col < W - 1)       # w + 1 < W
            valid = None
            for c in conds:
                valid = c if valid is None else (valid & c)
            taps.append((dh * W + dw, valid))
    return taps


def _im2col(x, taps, HW):
    """x: (C, HW) -> (9*C, HW); row block t is the tap-t shifted/masked image."""
    cols = []
    for shift, valid in taps:
        # want result[:, i] = x[:, i + shift]  =>  roll left by `shift`
        t = x if shift == 0 else pltpu.roll(x, shift=(-shift) % HW, axis=1)
        if valid is not None:
            t = jnp.where(valid, t, 0.0)        # zero the halo taps
        cols.append(t)
    return jnp.concatenate(cols, axis=0)


# ---------------------------------------------------------------------------
# Fused BasicBlock kernel: one grid step == one image
# ---------------------------------------------------------------------------
def _basic_block_kernel(x_ref, w1_ref, w2_ref, o_ref, *, H, W):
    HW = H * W
    Cout = o_ref.shape[1]

    taps = _spatial_taps(H, W)                      # hoisted; reused by both convs
    x = x_ref[0].astype(jnp.float32)                # (Cin, HW), channel-major

    # conv1 + ReLU: single MXU matmul, K = 9*Cin, output (Cout, HW) lane-dense
    h = jnp.dot(w1_ref[...], _im2col(x, taps, HW),
                preferred_element_type=jnp.float32)
    h = jnp.maximum(h, 0.0)

    # conv2 + identity shortcut + ReLU: K = 9*Cout
    y = jnp.dot(w2_ref[...], _im2col(h, taps, HW),
                preferred_element_type=jnp.float32)
    y = jnp.maximum(y + x, 0.0)

    # lane-dense store: last dim HW = 256 (multiple of 128)
    o_ref[...] = y.reshape(1, Cout, HW).astype(o_ref.dtype)


# ---------------------------------------------------------------------------
# Wrapper: NCHW in / NCHW out, matching the PyTorch module
# ---------------------------------------------------------------------------
def basic_block_forward(x_nchw, params, *, stride=1):
    N, Cin, H, W = x_nchw.shape
    Cout = params["w1"].shape[0]
    HW = H * W

    if stride != 1 or Cin != Cout:
        # TODO(synk): projection shortcut (1x1 strided conv3) + strided conv1 not
        # implemented in the fused kernel; only the identity-shortcut path is.
        raise NotImplementedError("fused kernel covers the identity-shortcut path")

    # Free view: NCHW -> (N, C, H*W).  No pad / transpose glue for activations.
    x = x_nchw.reshape(N, Cin, HW)

    # Weights (tiny, one-time): (Cout, Cin, 3, 3) -> (Cout, 9*Cin), row order
    # (kh, kw, cin) matching the im2col row order above.
    w1 = jnp.transpose(params["w1"], (0, 2, 3, 1)).reshape(Cout, 9 * Cin)
    w2 = jnp.transpose(params["w2"], (0, 2, 3, 1)).reshape(Cout, 9 * Cout)

    flops = 2 * N * HW * 9 * (Cin * Cout + Cout * Cout)
    bytes_accessed = 4 * (N * Cin * HW + w1.size + w2.size + N * Cout * HW)

    out = pl.pallas_call(
        functools.partial(_basic_block_kernel, H=H, W=W),
        out_shape=jax.ShapeDtypeStruct((N, Cout, HW), x_nchw.dtype),
        grid=(N,),
        in_specs=[
            pl.BlockSpec((1, Cin, HW), lambda n: (n, 0, 0)),
            pl.BlockSpec((Cout, 9 * Cin), lambda n: (0, 0)),
            pl.BlockSpec((Cout, 9 * Cout), lambda n: (0, 0)),
        ],
        out_specs=pl.BlockSpec((1, Cout, HW), lambda n: (n, 0, 0)),
        compiler_params=pltpu.CompilerParams(
            dimension_semantics=("parallel",)),   # N=2 -> both TCs on v7x
        cost_estimate=pl.CostEstimate(
            flops=flops, transcendentals=0, bytes_accessed=bytes_accessed),
    )(x, w1, w2)

    # Free view back to NCHW.
    return out.reshape(N, Cout, H, W)


# ---------------------------------------------------------------------------
# Deterministic parameter init (xavier_normal_, matching weights_init)
# ---------------------------------------------------------------------------
def xavier_normal(key, shape):
    # shape = (Cout, Cin, Kh, Kw); fan_in = Cin*Kh*Kw, fan_out = Cout*Kh*Kw
    cout, cin, kh, kw = shape
    fan_in, fan_out = cin * kh * kw, cout * kh * kw
    std = (2.0 / (fan_in + fan_out)) ** 0.5
    return std * jax.random.normal(key, shape, dtype=jnp.float32)


# ---------------------------------------------------------------------------
if __name__ == "__main__":
    in_planes, planes, stride = 4, 4, 1          # identity-shortcut config
    N, H, W = 2, 16, 16

    key = jax.random.PRNGKey(0)
    kx, k1, k2 = jax.random.split(key, 3)
    x = jax.random.normal(kx, (N, in_planes, H, W), dtype=jnp.float32)

    params = {
        "w1": xavier_normal(k1, (planes, in_planes, 3, 3)),
        "w2": xavier_normal(k2, (planes, planes, 3, 3)),
    }

    fwd = jax.jit(functools.partial(basic_block_forward, stride=stride))
    out = jax.block_until_ready(fwd(x, params))

    # Correctness check against plain-JAX convolution reference.
    def ref_conv(x_, w_, s):
        return jax.lax.conv_general_dilated(
            x_, w_, window_strides=(s, s), padding="SAME",
            dimension_numbers=("NCHW", "OIHW", "NCHW"))

    ref = jax.nn.relu(ref_conv(x, params["w1"], stride))
    ref = ref_conv(ref, params["w2"], 1) + x
    ref = jax.nn.relu(ref)

    assert out.shape == (N, planes, H, W)
    assert jnp.allclose(out, ref, atol=1e-4, rtol=1e-4), "mismatch vs reference"
    print("KERNEL_OK")
</pallas_src>

<mosaic_0001>
module attributes {stable_mosaic.version = 11 : i64} {
  func.func @_basic_block_kernel(%arg0: i32, %arg1: memref<1x4x256xf32, #tpu.memory_space<vmem>>, %arg2: memref<4x36xf32, #tpu.memory_space<vmem>>, %arg3: memref<4x36xf32, #tpu.memory_space<vmem>>, %arg4: memref<1x4x256xf32, #tpu.memory_space<vmem>>) attributes {dimension_semantics = [#tpu.dimension_semantics<parallel>], iteration_bounds = array<i64: 2>, scalar_prefetch = 0 : i64, scratch_operands = 0 : i64, tpu.core_type = #tpu.core_type<tc>, window_params = [{transform_indices = @transform_0, window_bounds = array<i64: 1, 4, 256>}, {pipeline_mode = #tpu.pipeline_mode<synchronous>, transform_indices = @transform_1, window_bounds = array<i64: 4, 36>}, {pipeline_mode = #tpu.pipeline_mode<synchronous>, transform_indices = @transform_2, window_bounds = array<i64: 4, 36>}, {transform_indices = @transform_3, window_bounds = array<i64: 1, 4, 256>}]} {
    %0 = tpu.iota {dimensions = array<i32: 1>} : vector<1x256xi32>
    %c15_i32 = arith.constant 15 : i32
    %1 = vector.broadcast %c15_i32 : i32 to vector<1x256xi32>
    %2 = arith.andi %0, %1 : vector<1x256xi32>
    %c16_i32 = arith.constant 16 : i32
    %3 = vector.broadcast %c16_i32 : i32 to vector<1x256xi32>
    %4 = arith.cmpi sge, %0, %3 : vector<1x256xi32>
    %c1_i32 = arith.constant 1 : i32
    %5 = vector.broadcast %c1_i32 : i32 to vector<1x256xi32>
    %6 = arith.cmpi sge, %2, %5 : vector<1x256xi32>
    %7 = arith.andi %4, %6 : vector<1x256xi1>
    %c16_i32_0 = arith.constant 16 : i32
    %8 = vector.broadcast %c16_i32_0 : i32 to vector<1x256xi32>
    %9 = arith.cmpi sge, %0, %8 : vector<1x256xi32>
    %c16_i32_1 = arith.constant 16 : i32
    %10 = vector.broadcast %c16_i32_1 : i32 to vector<1x256xi32>
    %11 = arith.cmpi sge, %0, %10 : vector<1x256xi32>
    %c15_i32_2 = arith.constant 15 : i32
    %12 = vector.broadcast %c15_i32_2 : i32 to vector<1x256xi32>
    %13 = arith.cmpi slt, %2, %12 : vector<1x256xi32>
    %14 = arith.andi %11, %13 : vector<1x256xi1>
    %c1_i32_3 = arith.constant 1 : i32
    %15 = vector.broadcast %c1_i32_3 : i32 to vector<1x256xi32>
    %16 = arith.cmpi sge, %2, %15 : vector<1x256xi32>
    %c15_i32_4 = arith.constant 15 : i32
    %17 = vector.broadcast %c15_i32_4 : i32 to vector<1x256xi32>
    %18 = arith.cmpi slt, %2, %17 : vector<1x256xi32>
    %c240_i32 = arith.constant 240 : i32
    %19 = vector.broadcast %c240_i32 : i32 to vector<1x256xi32>
    %20 = arith.cmpi slt, %0, %19 : vector<1x256xi32>
    %c1_i32_5 = arith.constant 1 : i32
    %21 = vector.broadcast %c1_i32_5 : i32 to vector<1x256xi32>
    %22 = arith.cmpi sge, %2, %21 : vector<1x256xi32>
    %23 = arith.andi %20, %22 : vector<1x256xi1>
    %c240_i32_6 = arith.constant 240 : i32
    %24 = vector.broadcast %c240_i32_6 : i32 to vector<1x256xi32>
    %25 = arith.cmpi slt, %0, %24 : vector<1x256xi32>
    %c240_i32_7 = arith.constant 240 : i32
    %26 = vector.broadcast %c240_i32_7 : i32 to vector<1x256xi32>
    %27 = arith.cmpi slt, %0, %26 : vector<1x256xi32>
    %c15_i32_8 = arith.constant 15 : i32
    %28 = vector.broadcast %c15_i32_8 : i32 to vector<1x256xi32>
    %29 = arith.cmpi slt, %2, %28 : vector<1x256xi32>
    %30 = arith.andi %27, %29 : vector<1x256xi1>
    %c0 = arith.constant 0 : index
    %c0_9 = arith.constant 0 : index
    %c0_10 = arith.constant 0 : index
    %31 = vector.load %arg1[%c0, %c0_9, %c0_10] : memref<1x4x256xf32, #tpu.memory_space<vmem>>, vector<1x4x256xf32>
    %32 = vector.shape_cast %31 : vector<1x4x256xf32> to vector<4x256xf32>
    %c0_11 = arith.constant 0 : index
    %c0_12 = arith.constant 0 : index
    %33 = vector.load %arg2[%c0_11, %c0_12] : memref<4x36xf32, #tpu.memory_space<vmem>>, vector<4x36xf32>
    %c17_i32 = arith.constant 17 : i32
    %34 = tpu.dynamic_rotate %32 by %c17_i32 dim 1 : vector<4x256xf32>, i32 -> vector<4x256xf32>
    %cst = arith.constant 0.000000e+00 : f32
    %35 = vector.shape_cast %7 : vector<1x256xi1> to vector<1x256xi1>
    %36 = vector.broadcast %35 : vector<1x256xi1> to vector<4x256xi1>
    %37 = vector.broadcast %cst : f32 to vector<4x256xf32>
    %38 = arith.select %36, %34, %37 : vector<4x256xi1>, vector<4x256xf32>
    %c16_i32_13 = arith.constant 16 : i32
    %39 = tpu.dynamic_rotate %32 by %c16_i32_13 dim 1 : vector<4x256xf32>, i32 -> vector<4x256xf32>
    %cst_14 = arith.constant 0.000000e+00 : f32
    %40 = vector.shape_cast %9 : vector<1x256xi1> to vector<1x256xi1>
    %41 = vector.broadcast %40 : vector<1x256xi1> to vector<4x256xi1>
    %42 = vector.broadcast %cst_14 : f32 to vector<4x256xf32>
    %43 = arith.select %41, %39, %42 : vector<4x256xi1>, vector<4x256xf32>
    %c15_i32_15 = arith.constant 15 : i32
    %44 = tpu.dynamic_rotate %32 by %c15_i32_15 dim 1 : vector<4x256xf32>, i32 -> vector<4x256xf32>
    %cst_16 = arith.constant 0.000000e+00 : f32
    %45 = vector.shape_cast %14 : vector<1x256xi1> to vector<1x256xi1>
    %46 = vector.broadcast %45 : vector<1x256xi1> to vector<4x256xi1>
    %47 = vector.broadcast %cst_16 : f32 to vector<4x256xf32>
    %48 = arith.select %46, %44, %47 : vector<4x256xi1>, vector<4x256xf32>
    %c1_i32_17 = arith.constant 1 : i32
    %49 = tpu.dynamic_rotate %32 by %c1_i32_17 dim 1 : vector<4x256xf32>, i32 -> vector<4x256xf32>
    %cst_18 = arith.constant 0.000000e+00 : f32
    %50 = vector.shape_cast %16 : vector<1x256xi1> to vector<1x256xi1>
    %51 = vector.broadcast %50 : vector<1x256xi1> to vector<4x256xi1>
    %52 = vector.broadcast %cst_18 : f32 to vector<4x256xf32>
    %53 = arith.select %51, %49, %52 : vector<4x256xi1>, vector<4x256xf32>
    %c255_i32 = arith.constant 255 : i32
    %54 = tpu.dynamic_rotate %32 by %c255_i32 dim 1 : vector<4x256xf32>, i32 -> vector<4x256xf32>
    %cst_19 = arith.constant 0.000000e+00 : f32
    %55 = vector.shape_cast %18 : vector<1x256xi1> to vector<1x256xi1>
    %56 = vector.broadcast %55 : vector<1x256xi1> to vector<4x256xi1>
    %57 = vector.broadcast %cst_19 : f32 to vector<4x256xf32>
    %58 = arith.select %56, %54, %57 : vector<4x256xi1>, vector<4x256xf32>
    %c241_i32 = arith.constant 241 : i32
    %59 = tpu.dynamic_rotate %32 by %c241_i32 dim 1 : vector<4x256xf32>, i32 -> vector<4x256xf32>
    %cst_20 = arith.constant 0.000000e+00 : f32
    %60 = vector.shape_cast %23 : vector<1x256xi1> to vector<1x256xi1>
    %61 = vector.broadcast %60 : vector<1x256xi1> to vector<4x256xi1>
    %62 = vector.broadcast %cst_20 : f32 to vector<4x256xf32>
    %63 = arith.select %61, %59, %62 : vector<4x256xi1>, vector<4x256xf32>
    %c240_i32_21 = arith.constant 240 : i32
    %64 = tpu.dynamic_rotate %32 by %c240_i32_21 dim 1 : vector<4x256xf32>, i32 -> vector<4x256xf32>
    %cst_22 = arith.constant 0.000000e+00 : f32
    %65 = vector.shape_cast %25 : vector<1x256xi1> to vector<1x256xi1>
    %66 = vector.broadcast %65 : vector<1x256xi1> to vector<4x256xi1>
    %67 = vector.broadcast %cst_22 : f32 to vector<4x256xf32>
    %68 = arith.select %66, %64, %67 : vector<4x256xi1>, vector<4x256xf32>
    %c239_i32 = arith.constant 239 : i32
    %69 = tpu.dynamic_rotate %32 by %c239_i32 dim 1 : vector<4x256xf32>, i32 -> vector<4x256xf32>
    %cst_23 = arith.constant 0.000000e+00 : f32
    %70 = vector.shape_cast %30 : vector<1x256xi1> to vector<1x256xi1>
    %71 = vector.broadcast %70 : vector<1x256xi1> to vector<4x256xi1>
    %72 = vector.broadcast %cst_23 : f32 to vector<4x256xf32>
    %73 = arith.select %71, %69, %72 : vector<4x256xi1>, vector<4x256xf32>
    %74 = tpu.concatenate %38, %43, %48, %53, %32, %58, %63, %68, %73 in 0 : vector<4x256xf32>, vector<4x256xf32>, vector<4x256xf32>, vector<4x256xf32>, vector<4x256xf32>, vector<4x256xf32>, vector<4x256xf32>, vector<4x256xf32>, vector<4x256xf32> -> vector<36x256xf32>
    %cst_24 = arith.constant dense<0.000000e+00> : vector<4x256xf32>
    %75 = tpu.matmul %33, %74, %cst_24 {dimension_numbers = #tpu.dot_dimension_numbers<[1], [0], [0], [1], [0, 0, 1, 1], [], []>} : vector<4x36xf32>, vector<36x256xf32>, vector<4x256xf32> -> vector<4x256xf32>
    %cst_25 = arith.constant 0.000000e+00 : f32
    %76 = vector.broadcast %cst_25 : f32 to vector<4x256xf32>
    %77 = arith.maximumf %75, %76 : vector<4x256xf32>
    %c0_26 = arith.constant 0 : index
    %c0_27 = arith.constant 0 : index
    %78 = vector.load %arg3[%c0_26, %c0_27] : memref<4x36xf32, #tpu.memory_space<vmem>>, vector<4x36xf32>
    %c17_i32_28 = arith.constant 17 : i32
    %79 = tpu.dynamic_rotate %77 by %c17_i32_28 dim 1 : vector<4x256xf32>, i32 -> vector<4x256xf32>
    %cst_29 = arith.constant 0.000000e+00 : f32
    %80 = vector.shape_cast %7 : vector<1x256xi1> to vector<1x256xi1>
    %81 = vector.broadcast %80 : vector<1x256xi1> to vector<4x256xi1>
    %82 = vector.broadcast %cst_29 : f32 to vector<4x256xf32>
    %83 = arith.select %81, %79, %82 : vector<4x256xi1>, vector<4x256xf32>
    %c16_i32_30 = arith.constant 16 : i32
    %84 = tpu.dynamic_rotate %77 by %c16_i32_30 dim 1 : vector<4x256xf32>, i32 -> vector<4x256xf32>
    %cst_31 = arith.constant 0.000000e+00 : f32
    %85 = vector.shape_cast %9 : vector<1x256xi1> to vector<1x256xi1>
    %86 = vector.broadcast %85 : vector<1x256xi1> to vector<4x256xi1>
    %87 = vector.broadcast %cst_31 : f32 to vector<4x256xf32>
    %88 = arith.select %86, %84, %87 : vector<4x256xi1>, vector<4x256xf32>
    %c15_i32_32 = arith.constant 15 : i32
    %89 = tpu.dynamic_rotate %77 by %c15_i32_32 dim 1 : vector<4x256xf32>, i32 -> vector<4x256xf32>
    %cst_33 = arith.constant 0.000000e+00 : f32
    %90 = vector.shape_cast %14 : vector<1x256xi1> to vector<1x256xi1>
    %91 = vector.broadcast %90 : vector<1x256xi1> to vector<4x256xi1>
    %92 = vector.broadcast %cst_33 : f32 to vector<4x256xf32>
    %93 = arith.select %91, %89, %92 : vector<4x256xi1>, vector<4x256xf32>
    %c1_i32_34 = arith.constant 1 : i32
    %94 = tpu.dynamic_rotate %77 by %c1_i32_34 dim 1 : vector<4x256xf32>, i32 -> vector<4x256xf32>
    %cst_35 = arith.constant 0.000000e+00 : f32
    %95 = vector.shape_cast %16 : vector<1x256xi1> to vector<1x256xi1>
    %96 = vector.broadcast %95 : vector<1x256xi1> to vector<4x256xi1>
    %97 = vector.broadcast %cst_35 : f32 to vector<4x256xf32>
    %98 = arith.select %96, %94, %97 : vector<4x256xi1>, vector<4x256xf32>
    %c255_i32_36 = arith.constant 255 : i32
    %99 = tpu.dynamic_rotate %77 by %c255_i32_36 dim 1 : vector<4x256xf32>, i32 -> vector<4x256xf32>
    %cst_37 = arith.constant 0.000000e+00 : f32
    %100 = vector.shape_cast %18 : vector<1x256xi1> to vector<1x256xi1>
    %101 = vector.broadcast %100 : vector<1x256xi1> to vector<4x256xi1>
    %102 = vector.broadcast %cst_37 : f32 to vector<4x256xf32>
    %103 = arith.select %101, %99, %102 : vector<4x256xi1>, vector<4x256xf32>
    %c241_i32_38 = arith.constant 241 : i32
    %104 = tpu.dynamic_rotate %77 by %c241_i32_38 dim 1 : vector<4x256xf32>, i32 -> vector<4x256xf32>
    %cst_39 = arith.constant 0.000000e+00 : f32
    %105 = vector.shape_cast %23 : vector<1x256xi1> to vector<1x256xi1>
    %106 = vector.broadcast %105 : vector<1x256xi1> to vector<4x256xi1>
    %107 = vector.broadcast %cst_39 : f32 to vector<4x256xf32>
    %108 = arith.select %106, %104, %107 : vector<4x256xi1>, vector<4x256xf32>
    %c240_i32_40 = arith.constant 240 : i32
    %109 = tpu.dynamic_rotate %77 by %c240_i32_40 dim 1 : vector<4x256xf32>, i32 -> vector<4x256xf32>
    %cst_41 = arith.constant 0.000000e+00 : f32
    %110 = vector.shape_cast %25 : vector<1x256xi1> to vector<1x256xi1>
    %111 = vector.broadcast %110 : vector<1x256xi1> to vector<4x256xi1>
    %112 = vector.broadcast %cst_41 : f32 to vector<4x256xf32>
    %113 = arith.select %111, %109, %112 : vector<4x256xi1>, vector<4x256xf32>
    %c239_i32_42 = arith.constant 239 : i32
    %114 = tpu.dynamic_rotate %77 by %c239_i32_42 dim 1 : vector<4x256xf32>, i32 -> vector<4x256xf32>
    %cst_43 = arith.constant 0.000000e+00 : f32
    %115 = vector.shape_cast %30 : vector<1x256xi1> to vector<1x256xi1>
    %116 = vector.broadcast %115 : vector<1x256xi1> to vector<4x256xi1>
    %117 = vector.broadcast %cst_43 : f32 to vector<4x256xf32>
    %118 = arith.select %116, %114, %117 : vector<4x256xi1>, vector<4x256xf32>
    %119 = tpu.concatenate %83, %88, %93, %98, %77, %103, %108, %113, %118 in 0 : vector<4x256xf32>, vector<4x256xf32>, vector<4x256xf32>, vector<4x256xf32>, vector<4x256xf32>, vector<4x256xf32>, vector<4x256xf32>, vector<4x256xf32>, vector<4x256xf32> -> vector<36x256xf32>
    %cst_44 = arith.constant dense<0.000000e+00> : vector<4x256xf32>
    %120 = tpu.matmul %78, %119, %cst_44 {dimension_numbers = #tpu.dot_dimension_numbers<[1], [0], [0], [1], [0, 0, 1, 1], [], []>} : vector<4x36xf32>, vector<36x256xf32>, vector<4x256xf32> -> vector<4x256xf32>
    %121 = arith.addf %120, %32 : vector<4x256xf32>
    %cst_45 = arith.constant 0.000000e+00 : f32
    %122 = vector.broadcast %cst_45 : f32 to vector<4x256xf32>
    %123 = arith.maximumf %121, %122 : vector<4x256xf32>
    %124 = vector.shape_cast %123 : vector<4x256xf32> to vector<1x4x256xf32>
    %c0_46 = arith.constant 0 : index
    %c0_47 = arith.constant 0 : index
    %c0_48 = arith.constant 0 : index
    %125 = vector.load %arg4[%c0_46, %c0_47, %c0_48] : memref<1x4x256xf32, #tpu.memory_space<vmem>>, vector<1x4x256xf32>
    tpu.vector_store %arg4[%c0_46, %c0_47, %c0_48], %124 {strides = array<i32>} : memref<1x4x256xf32, #tpu.memory_space<vmem>>, vector<1x4x256xf32>,
    return
  }
  func.func @transform_0(%arg0: i32) -> (i32, i32, i32) {
    %c0_i32 = arith.constant 0 : i32
    %c0_i32_0 = arith.constant 0 : i32
    %c0_i32_1 = arith.constant 0 : i32
    return %arg0, %c0_i32, %c0_i32_0 : i32, i32, i32
  }
  func.func @transform_1(%arg0: i32) -> (i32, i32) {
    %c0_i32 = arith.constant 0 : i32
    %c0_i32_0 = arith.constant 0 : i32
    %c0_i32_1 = arith.constant 0 : i32
    return %c0_i32, %c0_i32_0 : i32, i32
  }
  func.func @transform_2(%arg0: i32) -> (i32, i32) {
    %c0_i32 = arith.constant 0 : i32
    %c0_i32_0 = arith.constant 0 : i32
    %c0_i32_1 = arith.constant 0 : i32
    return %c0_i32, %c0_i32_0 : i32, i32
  }
  func.func @transform_3(%arg0: i32) -> (i32, i32, i32) {
    %c0_i32 = arith.constant 0 : i32
    %c0_i32_0 = arith.constant 0 : i32
    %c0_i32_1 = arith.constant 0 : i32
    return %arg0, %c0_i32, %c0_i32_0 : i32, i32, i32
  }
}

</mosaic_0001>

<bundles_post_ra>
// kernel: basic_block_forward.1
= control target key start
LH: loop header
LB: loop body
LE: loop exit
PB: predicated region body
PF: predicated region fallthrough
CT: control target
= control target key end

     0   :  { %s816_s12 = smov 0   ;;  %s1095_s0 = inlined_call_operand.vmem [shape: f32[2,4,256], index: 0, kind: input, shape index: {}]   ;;  %s1096_s1 = inlined_call_operand.vmem [shape: f32[4,36], index: 1, kind: input, shape index: {}]   ;;  %s1097_s2 = inlined_call_operand.vmem [shape: f32[4,36], index: 2, kind: input, shape index: {}]   ;;  %s1098_s3 = inlined_call_operand.vmem [shape: f32[2,4,256], index: 3, kind: output, shape index: {}]  }
   0x1 LB: > { %s656_s13 = sadd.s32 4294967295, %s785_s12   ;;  %p660_p0 = scmp.ge.s32.totalorder %s785_s12, 1  ;;  %s785_s12 = sphi %s816_s12, %s13_s12  }
   0x2   : > { %p137_p1 = scmp.lt.s32.totalorder %s785_s12, 3 }
   0x4   : > { %p138_p2 = pnand %p660_p0, %p137_p1 }
   0x5   : > { %p161_p3 = scmp.lt.s32.totalorder (!%p138_p2), %s656_s13, 1  ;;  %s787_s18 = smov (!%p138_p2), 17   ;;  %v795_v3 = vmov (!%p138_p2), 0.0   ;;  %v171_v4 = vlaneseq (!%p138_p2)  ;;  %vm325_vm9 = vcmask (!%p138_p2), 1043456  }
   0x6   : > { %141 = sbr.rel (%p138_p2) target bundleno = 740 (0x2e4), region = 32  ;;  %s788_s19 = smov (!%p138_p2), 1   ;;  %408 = vmatprep.mubr.f32.mxu0 (!%p138_p2), %v795_v3  ;;  %587 = vmatprep.mubr.f32.mxu1 (!%p138_p2), %v795_v3 }
   0x7   : > { %s789_s20 = smov (!%p138_p2), 15   ;;  %s790_s21 = smov (!%p138_p2), 16   ;;  %v851_v5 = vand.u32 (!%p138_p2), 127, %v171_v4 }
   0x8   : > { %s791_s22 = smov (!%p138_p2), 127   ;;  %s792_s23 = smov (!%p138_p2), 112  }
   0x9   : > { %s793_s24 = smov (!%p138_p2), 113   ;;  %s794_s25 = smov (!%p138_p2), 111   ;;  %v854_v6 = vadd.s32 (!%p138_p2), 128, %v851_v5  ;;  %v174_v7 = vand.u32 (!%p138_p2), 15, %v851_v5  ;;  %vm240_vm0 = vcmp.lt.s32.totalorder (!%p138_p2), %v851_v5, 1  ;;  %vm214_vm1 = vcmp.lt.s32.totalorder (!%p138_p2), %v851_v5, 16 }
   0xa   : > { %vm1099_vm3 = vcmp.lt.s32.totalorder (!%p138_p2), %v851_v5, 17  ;;  %vm176_vm4 = vcmp.ge.s32.totalorder (!%p138_p2), %v851_v5, 16  ;;  %vm1100_vm7 = vcmp.lt.s32.totalorder (!%p138_p2), %v851_v5, 127  ;;  %vm227_vm8 = vcmp.lt.s32.totalorder (!%p138_p2), %v851_v5, 15 }
   0xb   : > { %v175_v8 = vand.u32 (!%p138_p2), 15, %v854_v6  ;;  %vm866_vm5 = vcmp.ge.s32.totalorder (!%p138_p2), %v174_v7, 1  ;;  %vm870_vm6 = vcmp.lt.s32.totalorder (!%p138_p2), %v174_v7, 15  ;;  %vm187_vm12 = vcmp.lt.s32.totalorder (!%p138_p2), %v854_v6, 240 }
   0xc   : > { %vm886_vm10 = vmand (!%p138_p2), %vm176_vm4, %vm866_vm5  ;;  %vm1101_vm13 = vcmp.lt.s32.totalorder (!%p138_p2), %v851_v5, 112  ;;  %vm1102_vm14 = vcmp.lt.s32.totalorder (!%p138_p2), %v851_v5, 113 }
   0xd   : > { %s1128_s13 = smov (!%p161_p3, %s656_s13), 1  ;;  %vm860_vm2 = vcmp.ge.s32.totalorder %v175_v8, 1  ;;  %vm892_vm11 = vcmp.lt.s32.totalorder %v175_v8, 15  ;;  %vm905_vm15 = vmand %vm176_vm4, %vm870_vm6 }
   0xe   : > { %s673_s14 = sshll.u32 %s1128_s13, 3 }
   0xf   : > { %s165_s17 = scalar_lea.vmem %s1095_s0, %s673_s14  ;;  %s170_s5 = scalar_lea.vmem %s1098_s3, %s673_s14 }
  0x10   : > { %v832_v0 = vld [vmem:[%s165_s17] sm:$0xff] }
  0x11   : > { %v836_v1 = vcombine.high %v832_v0, %v832_v0 }
  0x13   : > { %v718_v2 = vpack.i.bf16 %v836_v1, %v832_v0 }
  0x15   : > { %719 = vrot.lane.b32.xlu1 %v718_v2, %s787_s18  ;;  %709 = vrot.lane.b32.xlu0 %v718_v2, %s788_s19 }
  0x19   : > { %724 = vrot.lane.b32.xlu1 %v718_v2, %s789_s20  ;;  %714 = vrot.lane.b32.xlu0 %v718_v2, %s790_s21 }
  0x1d   : > { %729 = vrot.lane.b32.xlu0 %v718_v2, %s791_s22  ;;  %734 = vrot.lane.b32.xlu1 %v718_v2, %s792_s23 }
  0x21   : > { %739 = vrot.lane.b32.xlu0 %v718_v2, %s793_s24  ;;  %288 = vrot.lane.b32.xlu1 %v832_v0, %s794_s25 }
  0x25   : > { %290 = vrot.lane.b32.xlu0 %v836_v1, %s794_s25 }
  0x87   : > { %v720_v9 = vpop.permute.xlu1 %719  ;;  %v710_v10 = vpop.permute.xlu0 %709 }
  0x88   : > { %v722_v13 = vunpack.i.h.bf16 %v720_v9  ;;  %v721_v14 = vunpack.i.l.bf16 %v720_v9  ;;  %v712_v15 = vunpack.i.h.bf16 %v710_v10  ;;  %v711_v16 = vunpack.i.l.bf16 %v710_v10 }
  0x8a   : > { %v241_v18 = vsel %vm240_vm0, %v711_v16, %v712_v15  ;;  %v242_v19 = vsel %vm240_vm0, %v712_v15, %v711_v16  ;;  %v202_v20 = vsel %vm1099_vm3, %v721_v14, %v722_v13  ;;  %v203_v22 = vsel %vm1099_vm3, %v722_v13, %v721_v14 }
  0x8b   : > { %v725_v23 = vpop.permute.xlu1 %724  ;;  %v715_v24 = vpop.permute.xlu0 %714  ;;  %v248_v26 = vsel %vm860_vm2, %v241_v18, 0.0  ;;  %v209_v32 = vsel %vm860_vm2, %v202_v20, 0.0  ;;  %v208_v34 = vsel %vm886_vm10, %v203_v22, 0.0  ;;  %v247_v35 = vsel %vm866_vm5, %v242_v19, 0.0 }
  0x8c   : > { %v727_v27 = vunpack.i.h.bf16 %v725_v23  ;;  %v726_v28 = vunpack.i.l.bf16 %v725_v23  ;;  %v717_v29 = vunpack.i.h.bf16 %v715_v24  ;;  %v716_v30 = vunpack.i.l.bf16 %v715_v24 }
  0x8d   : > { %v310_v33 = vrot.slane %v248_v26, 4  ;;  %vm292_vm3 = vcmp.lt.s32.totalorder %v851_v5, 111  ;;  %v309_v53 = vrot.slane %v247_v35, 4 }
  0x8e   : > { %v216_v36 = vsel %vm214_vm1, %v717_v29, %v716_v30  ;;  %v215_v37 = vsel %vm214_vm1, %v716_v30, %v717_v29  ;;  %v228_v38 = vsel %vm227_vm8, %v726_v28, %v727_v27  ;;  %v229_v39 = vsel %vm227_vm8, %v727_v27, %v726_v28 }
  0x8f   : > { %v730_v40 = vpop.permute.xlu0 %729  ;;  %v735_v41 = vpop.permute.xlu1 %734  ;;  %v235_v42 = vsel %vm892_vm11, %v228_v38, 0.0  ;;  %v304_v43 = vrot.slane %v215_v37, 4  ;;  %v221_v44 = vsel %vm176_vm4, %v216_v36, 0.0  ;;  %v234_v45 = vsel %vm905_vm15, %v229_v39, 0.0  ;;  %v193_v36 = vld [vmem:[%s1096_s1] sm:$0xf] }
  0x90   : > { %v732_v46 = vunpack.i.h.bf16 %v730_v40  ;;  %v731_v47 = vunpack.i.l.bf16 %v730_v40  ;;  %v737_v48 = vunpack.i.h.bf16 %v735_v41  ;;  %v736_v49 = vunpack.i.l.bf16 %v735_v41 }
  0x91   : > { %v327_v50 = vsel %vm325_vm9, %v209_v32, %v304_v43  ;;  %v329_v51 = vsel %vm325_vm9, %v235_v42, %v310_v33  ;;  %v303_v52 = vrot.slane %v221_v44, 4  ;;  %v328_v62 = vsel %vm325_vm9, %v234_v45, %v309_v53 }
  0x92   : > { %v254_v54 = vsel %vm1100_vm7, %v731_v47, %v732_v46  ;;  %v255_v55 = vsel %vm1100_vm7, %v732_v46, %v731_v47  ;;  %v280_v56 = vsel %vm1101_vm13, %v736_v49, %v737_v48  ;;  %v281_v57 = vsel %vm1101_vm13, %v737_v48, %v736_v49  ;;  %vm952_vm7 = vmand %vm187_vm12, %vm860_vm2 }
  0x93   : > { %v260_v58 = vsel %vm870_vm6, %v254_v54, 0.0  ;;  %v261_v59 = vsel %vm892_vm11, %v255_v55, 0.0  ;;  %v287_v60 = vsel %vm187_vm12, %v281_v57, 0.0  ;;  %v740_v61 = vpop.permute.xlu0 %739  ;;  %v321_v3 = vrot.slane %v280_v56, 4  ;;  %v289_v14 = vpop.permute.xlu1 %288  ;;  %vm966_vm13 = vmand %vm187_vm12, %vm892_vm11 }
  0x94   : > { %v315_v63 = vrot.slane %v260_v58, 4  ;;  %v316_v2 = vrot.slane %v261_v59, 4  ;;  %v742_v4 = vunpack.i.h.bf16 %v740_v61  ;;  %v322_v7 = vrot.slane %v287_v60, 4 }
  0x95   : > { %v741_v8 = vunpack.i.l.bf16 %v740_v61  ;;  %v675_v9 = vpack.c.bf16 %v329_v51, %v327_v50  ;;  %v326_v10 = vsel %vm325_vm9, %v208_v34, %v303_v52 }
  0x96   : > { %v677_v15 = vpack.c.bf16 %v328_v62, %v326_v10  ;;  %v331_v26 = vsel %vm325_vm9, %v836_v1, %v316_v2  ;;  %v330_v28 = vsel %vm325_vm9, %v832_v0, %v315_v63 }
  0x97   : > { %v267_v16 = vsel %vm1102_vm14, %v741_v8, %v742_v4  ;;  %v268_v18 = vsel %vm1102_vm14, %v742_v4, %v741_v8  ;;  %676 = vmatprep.subr.bf16.mxu0 %v675_v9  ;;  %v291_v19 = vpop.permute.xlu0 %290  ;;  %vm334_vm14 = vcmask 293888  }
  0x98   : > { %678 = vmatpush1.bf16.msra.mxu0 %v677_v15  ;;  %v274_v20 = vsel %vm952_vm7, %v268_v18, 0.0  ;;  %v294_v23 = vsel %vm292_vm3, %v291_v19, %v289_v14  ;;  %v273_v24 = vsel %vm866_vm5, %v267_v16, 0.0  ;;  %v293_v33 = vsel %vm292_vm3, %v289_v14, %v291_v19 }
  0x99   : > { %v333_v27 = vsel %vm325_vm9, %v274_v20, %v322_v7  ;;  %v332_v29 = vsel %vm325_vm9, %v273_v24, %v321_v3  ;;  %v300_v34 = vsel %vm966_vm13, %v294_v23, 0.0  ;;  %v299_v35 = vsel %vm870_vm6, %v293_v33, 0.0 }
  0x9a   : > { %v679_v30 = vpack.c.bf16 %v333_v27, %v331_v26  ;;  %v681_v32 = vpack.c.bf16 %v332_v29, %v330_v28 }
  0x9c   : > { %680 = vmatprep.subr.bf16.mxu0 %v679_v30 }
  0x9d   : > { %682 = vmatpush1.bf16.msra.mxu0 %v681_v32 }
  0x9e   : > { %665 = vmatprep.subr.msk.mxu0 %vm325_vm9, %v300_v34 }
  0xa1   : > { %666 = vmatpush1.msk.msra.mxu0 %vm325_vm9, %v299_v35 }
  0xa2   : > { %667 = vmatmul.mubr.msk.f32.vlgmr.msra.gmra.mrb[0].mxu0 %vm334_vm14, %v193_v36 }
 0x175   : > { %v410_v37 = vpop.f32.mrb[0].mxu0 }
 0x176   : > { %v992_v38 = vmax.f32 %v410_v37, 0.0  ;;  %v412_v39 = vpop.f32.mrb[1].mxu0 }
 0x177   : > { %v994_v40 = vmax.f32 %v412_v39, 0.0 }
 0x179   : > { %v748_v41 = vpack.i.bf16 %v994_v40, %v992_v38 }
 0x17b   : > { %749 = vrot.lane.b32.xlu0 %v748_v41, %s790_s21  ;;  %744 = vrot.lane.b32.xlu1 %v748_v41, %s788_s19 }
 0x17f   : > { %759 = vrot.lane.b32.xlu0 %v748_v41, %s789_s20  ;;  %754 = vrot.lane.b32.xlu1 %v748_v41, %s787_s18 }
 0x183   : > { %769 = vrot.lane.b32.xlu0 %v748_v41, %s792_s23  ;;  %764 = vrot.lane.b32.xlu1 %v748_v41, %s791_s22 }
 0x187   : > { %474 = vrot.lane.b32.xlu0 %v992_v38, %s794_s25  ;;  %774 = vrot.lane.b32.xlu1 %v748_v41, %s793_s24 }
 0x18b   : > { %476 = vrot.lane.b32.xlu1 %v994_v40, %s794_s25 }
 0x1ed   : > { %v750_v42 = vpop.permute.xlu0 %749  ;;  %v745_v43 = vpop.permute.xlu1 %744 }
 0x1ee   : > { %v752_v44 = vunpack.i.h.bf16 %v750_v42  ;;  %v751_v45 = vunpack.i.l.bf16 %v750_v42  ;;  %v747_v46 = vunpack.i.h.bf16 %v745_v43  ;;  %v746_v47 = vunpack.i.l.bf16 %v745_v43 }
 0x1f0   : > { %v431_v48 = vsel %vm214_vm1, %v752_v44, %v751_v45  ;;  %v446_v49 = vsel %vm240_vm0, %v746_v47, %v747_v46  ;;  %v447_v50 = vsel %vm240_vm0, %v747_v46, %v746_v47  ;;  %v430_v51 = vsel %vm214_vm1, %v751_v45, %v752_v44 }
 0x1f1   : > { %v760_v52 = vpop.permute.xlu0 %759  ;;  %v755_v53 = vpop.permute.xlu1 %754  ;;  %v449_v54 = vsel %vm860_vm2, %v446_v49, 0.0  ;;  %v432_v55 = vsel %vm176_vm4, %v431_v48, 0.0  ;;  %v448_v56 = vsel %vm866_vm5, %v447_v50, 0.0  ;;  %v485_v61 = vrot.slane %v430_v51, 4 }
 0x1f2   : > { %v762_v57 = vunpack.i.h.bf16 %v760_v52  ;;  %v761_v58 = vunpack.i.l.bf16 %v760_v52  ;;  %v757_v59 = vunpack.i.h.bf16 %v755_v53  ;;  %v756_v60 = vunpack.i.l.bf16 %v755_v53 }
 0x1f3   : > { %v491_v62 = vrot.slane %v449_v54, 4  ;;  %v484_v63 = vrot.slane %v432_v55, 4  ;;  %v490_v2 = vrot.slane %v448_v56, 4  ;;  %vm1119_vm0 = vcmp.lt.s32.totalorder %v851_v5, 17 }
 0x1f4   : > { %v422_v3 = vsel %vm1119_vm0, %v756_v60, %v757_v59  ;;  %v438_v4 = vsel %vm227_vm8, %v761_v58, %v762_v57  ;;  %vm1120_vm1 = vmmov %vm1119_vm0  ;;  %v439_v8 = vsel %vm227_vm8, %v762_v57, %v761_v58  ;;  %vm1122_vm4 = vcmp.lt.s32.totalorder %v851_v5, 127 }
 0x1f5   : > { %v423_v7 = vsel %vm1120_vm1, %v757_v59, %v756_v60  ;;  %v770_v9 = vpop.permute.xlu0 %769  ;;  %v765_v10 = vpop.permute.xlu1 %764  ;;  %v425_v14 = vsel %vm860_vm2, %v422_v3, 0.0  ;;  %v441_v15 = vsel %vm892_vm11, %v438_v4, 0.0  ;;  %v440_v18 = vsel %vm905_vm15, %v439_v8, 0.0  ;;  %vm1123_vm8 = vmmov %vm1122_vm4 }
 0x1f6   : > { %v424_v16 = vsel %vm886_vm10, %v423_v7, 0.0  ;;  %v772_v19 = vunpack.i.h.bf16 %v770_v9  ;;  %v771_v20 = vunpack.i.l.bf16 %v770_v9  ;;  %v767_v23 = vunpack.i.h.bf16 %v765_v10 }
 0x1f7   : > { %v766_v24 = vunpack.i.l.bf16 %v765_v10  ;;  %v507_v26 = vsel %vm325_vm9, %v425_v14, %v485_v61  ;;  %v509_v27 = vsel %vm325_vm9, %v441_v15, %v491_v62  ;;  %v506_v11 = vsel %vm325_vm9, %v424_v16, %v484_v63 }
 0x1f8   : > { %vm1121_vm2 = vcmp.lt.s32.totalorder %v851_v5, 112  ;;  %v508_v29 = vsel %vm325_vm9, %v440_v18, %v490_v2  ;;  %v683_v42 = vpack.c.bf16 %v509_v27, %v507_v26  ;;  %vm1125_vm15 = vcmp.lt.s32.totalorder %v851_v5, 113 }
 0x1f9   : > { %v471_v28 = vsel %vm1121_vm2, %v772_v19, %v771_v20  ;;  %v454_v21 = vsel %vm1122_vm4, %v766_v24, %v767_v23  ;;  %v455_v31 = vsel %vm1123_vm8, %v767_v23, %v766_v24  ;;  %v775_v33 = vpop.permute.xlu1 %774  ;;  %vm1124_vm10 = vmmov %vm1121_vm2  ;;  %v685_v43 = vpack.c.bf16 %v508_v29, %v506_v11  ;;  %v475_v49 = vpop.permute.xlu0 %474 }
 0x1fa   : > { %v456_v30 = vsel %vm870_vm6, %v454_v21, 0.0  ;;  %v457_v32 = vsel %vm892_vm11, %v455_v31, 0.0  ;;  %v470_v34 = vsel %vm1124_vm10, %v771_v20, %v772_v19  ;;  %v473_v35 = vsel %vm187_vm12, %v471_v28, 0.0  ;;  %vm1126_vm11 = vmmov %vm1125_vm15  ;;  %684 = vmatprep.subr.bf16.mxu1 %v683_v42 }
 0x1fb   : > { %v496_v36 = vrot.slane %v456_v30, 4  ;;  %v777_v37 = vunpack.i.h.bf16 %v775_v33  ;;  %v497_v39 = vrot.slane %v457_v32, 4  ;;  %v776_v41 = vunpack.i.l.bf16 %v775_v33  ;;  %686 = vmatpush1.bf16.msra.mxu1 %v685_v43 }
 0x1fc   : > { %v502_v44 = vrot.slane %v470_v34, 4  ;;  %v503_v45 = vrot.slane %v473_v35, 4 }
 0x1fd   : > { %v462_v46 = vsel %vm1125_vm15, %v776_v41, %v777_v37  ;;  %v463_v25 = vsel %vm1126_vm11, %v777_v37, %v776_v41  ;;  %v477_v47 = vpop.permute.xlu1 %476  ;;  %v511_v50 = vsel %vm325_vm9, %v994_v40, %v497_v39  ;;  %v510_v52 = vsel %vm325_vm9, %v992_v38, %v496_v36  ;;  %v417_v38 = vld [vmem:[%s1097_s2] sm:$0xf] }
 0x1fe   : > { %v465_v6 = vsel %vm952_vm7, %v463_v25, 0.0  ;;  %v464_v48 = vsel %vm866_vm5, %v462_v46, 0.0  ;;  %v479_v54 = vsel %vm292_vm3, %v477_v47, %v475_v49  ;;  %v478_v12 = vsel %vm292_vm3, %v475_v49, %v477_v47 }
 0x1ff   : > { %v513_v51 = vsel %vm325_vm9, %v465_v6, %v503_v45  ;;  %v512_v53 = vsel %vm325_vm9, %v464_v48, %v502_v44  ;;  %v481_v40 = vsel %vm966_vm13, %v479_v54, 0.0  ;;  %v480_v56 = vsel %vm870_vm6, %v478_v12, 0.0 }
 0x200   : > { %v687_v55 = vpack.c.bf16 %v513_v51, %v511_v50  ;;  %v689_v13 = vpack.c.bf16 %v512_v53, %v510_v52 }
 0x202   : > { %688 = vmatprep.subr.bf16.mxu1 %v687_v55 }
 0x203   : > { %690 = vmatpush1.bf16.msra.mxu1 %v689_v13 }
 0x204   : > { %668 = vmatprep.subr.msk.mxu1 %vm325_vm9, %v481_v40 }
 0x207   : > { %669 = vmatpush1.msk.msra.mxu1 %vm325_vm9, %v480_v56 }
 0x208   : > { %670 = vmatmul.mubr.msk.f32.vlgmr.msra.gmra.mrb[0].mxu1 %vm334_vm14, %v417_v38 }
 0x2db   : > { %v589_v57 = vpop.f32.mrb[0].mxu1 }
 0x2dc   : > { %v590_v5 = vadd.f32 %v589_v57, %v832_v0  ;;  %v591_v58 = vpop.f32.mrb[1].mxu1 }
 0x2dd   : > { %v592_v22 = vadd.f32 %v591_v58, %v836_v1 }
 0x2de   : > { %v594_v59 = vmax.f32 %v590_v5, 0.0 }
 0x2df   : > { %v595_v60 = vmax.f32 %v592_v22, 0.0 }
 0x2e1   : > { %v598_v61 = vcombine.low %v594_v59, %v595_v60 }
 0x2e3   : > { %600 = vst [vmem:[%s170_s5] sm:$0xff] %v598_v61 }
 0x2e4 PF: > { %s13_s12 = sadd.s32 1, %s785_s12  }
 0x2e5   : > { %p10_p4 = scmp.ge.s32.totalorder %s13_s12, 4  }
 0x2e7   :  { %12 = sbr.rel (!%p10_p4) target bundleno = 1 (0x1), region = 62 }

</bundles_post_ra>
